<compile_context>
chip_gen: v7x
topology: tpu7x:2x2x1
jax: 0.10.0
libtpu: 0.0.40
codegen_flags: <defaults>
</compile_context>

<pallas_src>
import functools
import math

import numpy as np
import jax
import jax.numpy as jnp
from jax import lax
from jax.experimental import pallas as pl
from jax.experimental.pallas import tpu as pltpu


_LANE = 128
_SUBLANE = 8


def _round_up(x, m):
    return -(-x // m) * m


# -----------------------------------------------------------------------------
# Host-side scalar logic (python port of MyRandomResizedCrop.get_params).
# -----------------------------------------------------------------------------
def _get_params(height, width, scale, ratio, rng):
    area = height * width
    log_ratio = (math.log(ratio[0]), math.log(ratio[1]))
    for _ in range(10):
        target_area = area * rng.uniform(scale[0], scale[1])
        aspect_ratio = math.exp(rng.uniform(log_ratio[0], log_ratio[1]))
        w = int(round(math.sqrt(target_area * aspect_ratio)))
        h = int(round(math.sqrt(target_area / aspect_ratio)))
        if 0 < w <= width and 0 < h <= height:
            i = int(rng.integers(0, height - h + 1))
            j = int(rng.integers(0, width - w + 1))
            return i, j, h, w
    # Fallback to central crop
    in_ratio = float(width) / float(height)
    if in_ratio < min(ratio):
        w = width
        h = int(round(w / min(ratio)))
    elif in_ratio > max(ratio):
        h = height
        w = int(round(h * max(ratio)))
    else:
        w = width
        h = height
    i = (height - h) // 2
    j = (width - w) // 2
    return i, j, h, w


def _bilinear_rows(crop_size, out_size):
    """(i0, i1, w0, w1) per output row: PyTorch bilinear, align_corners=False,
    antialias=False."""
    scale = crop_size / out_size
    dst = np.arange(out_size, dtype=np.float64)
    src = np.maximum((dst + 0.5) * scale - 0.5, 0.0)
    i0 = np.minimum(np.floor(src).astype(np.int64), crop_size - 1)
    i1 = np.minimum(i0 + 1, crop_size - 1)
    w1 = (src - i0).astype(np.float32)
    w0 = (1.0 - w1).astype(np.float32)
    return i0, i1, w0, w1


def _crop_bilinear_matrix(in_full, crop_start, crop_size, out_size, out_pad):
    """(out_pad, in_full) matrix that crops [crop_start, crop_start+crop_size)
    of a length-`in_full` axis and bilinear-resizes it to `out_size`.
    Rows >= out_size and columns outside the crop are exactly zero (sublane /
    lane padding and crop fusion)."""
    i0, i1, w0, w1 = _bilinear_rows(crop_size, out_size)
    mat = np.zeros((out_pad, in_full), dtype=np.float32)
    rows = np.arange(out_size)
    mat[rows, crop_start + i0] += w0
    mat[rows, crop_start + i1] += w1
    return mat


def _plain_bilinear_matrix(in_size, out_size):
    """(out_size, in_size) plain bilinear matrix — host reference only."""
    i0, i1, w0, w1 = _bilinear_rows(in_size, out_size)
    mat = np.zeros((out_size, in_size), dtype=np.float32)
    rows = np.arange(out_size)
    mat[rows, i0] += w0
    mat[rows, i1] += w1
    return mat


# -----------------------------------------------------------------------------
# Generation-aware sizing
# -----------------------------------------------------------------------------
@functools.lru_cache(maxsize=None)
def _tpu_config():
    vmem_phys = 64 << 20            # conservative default (v7x per-TC VMEM)
    num_tc = 1
    try:
        info = pltpu.get_tpu_info()
        v = int(getattr(info, "vmem_capacity_bytes", 0) or 0)
        if v > 0:
            vmem_phys = v
    except Exception:
        pass
    try:
        kind = jax.devices()[0].device_kind.lower()
        if "v7" in kind:
            num_tc = 2              # v7x: two TensorCores share the grid
    except Exception:
        pass
    # v7x (64 MiB) -> 48 MiB ; v5e/v6e (128 MiB) -> 96 MiB.
    vmem_limit = int(min(vmem_phys * 3 // 4, 100 << 20))
    return vmem_limit, num_tc


def _plan_blocks(m_total, h_img, w_img, out_hp, out_wp,
                 in_itemsize, out_itemsize, compute_itemsize,
                 wy_first, vmem_limit, num_tc):
    """Pick (m_blk, grid steps, padded M) counting double-buffering explicitly."""
    # Grid-invariant weights (double-buffered by the default pipeline).
    weight_bytes = 2 * (out_hp * h_img + w_img * out_wp) * compute_itemsize
    # Per-channel temporaries (live range bounded by the fori_loop body).
    if wy_first:
        tmp_bytes = (h_img * w_img * compute_itemsize
                     + out_hp * w_img * (4 + compute_itemsize)
                     + out_hp * out_wp * 4)
    else:
        tmp_bytes = (h_img * w_img * compute_itemsize
                     + h_img * out_wp * (4 + compute_itemsize)
                     + out_hp * out_wp * 4)
    headroom = 2 << 20
    fixed = weight_bytes + tmp_bytes + headroom
    # img block + out block, each double-buffered by the pipeline.
    per_m = 2 * (h_img * w_img * in_itemsize + out_hp * out_wp * out_itemsize)
    budget = max(vmem_limit - fixed, per_m)
    blk = max(1, min(m_total, budget // per_m))
    if num_tc > 1 and m_total > 1:
        blk = min(blk, -(-m_total // num_tc))     # >= num_tc grid steps
    steps = -(-m_total // blk)
    if num_tc > 1 and m_total > 1:
        steps = -(-steps // num_tc) * num_tc      # equal work per TensorCore
    m_pad = steps * blk                           # pad M instead of shrinking blk
    return int(blk), int(steps), int(m_pad)


# -----------------------------------------------------------------------------
# Pallas kernel
# -----------------------------------------------------------------------------
def _make_kernel(m_blk, out_dtype, compute_dtype, wy_first, unroll):
    out_dtype = jnp.dtype(out_dtype)
    int_out = jnp.issubdtype(out_dtype, jnp.integer)
    if int_out:
        lo = int(jnp.iinfo(out_dtype).min)
        hi = int(jnp.iinfo(out_dtype).max)

    def _finish(res):
        if int_out:
            res = jnp.clip(jnp.round(res), lo, hi)
        return res.astype(out_dtype)

    def kernel(wy_ref, img_ref, wxt_ref, o_ref):
        wy = wy_ref[...]            # (out_hp, H)   compute_dtype
        wxt = wxt_ref[...]          # (W, out_wp)   compute_dtype

        def body(m, carry):
            # Cast one channel at a time (keeps VMEM temporaries per-channel).
            img_m = img_ref[m].astype(compute_dtype)            # (H, W)
            if wy_first:
                t = jnp.dot(wy, img_m,
                            preferred_element_type=jnp.float32)  # (out_hp, W)
                res = jnp.dot(t.astype(compute_dtype), wxt,
                              preferred_element_type=jnp.float32)  # (out_hp, out_wp)
            else:
                t = jnp.dot(img_m, wxt,
                            preferred_element_type=jnp.float32)  # (H, out_wp)
                res = jnp.dot(wy, t.astype(compute_dtype),
                              preferred_element_type=jnp.float32)  # (out_hp, out_wp)
            # Unmasked lane-dense, sublane-aligned slab store (out_hp%8==0,
            # out_wp%128==0).
            o_ref[m] = _finish(res)
            return carry

        lax.fori_loop(0, m_blk, body, 0, unroll=unroll)

    return kernel


@functools.partial(jax.jit, static_argnames=("out_h", "out_w"))
def _crop_resize_core(img, wy, wxt, *, out_h, out_w):
    lead = img.shape[:-2]
    h_img, w_img = img.shape[-2:]
    out_hp, out_wp = wy.shape[0], wxt.shape[1]
    compute_dtype = wy.dtype
    in_itemsize = jnp.dtype(img.dtype).itemsize
    compute_itemsize = jnp.dtype(compute_dtype).itemsize
    m_total = math.prod(lead) if lead else 1
    x = img.reshape((m_total, h_img, w_img))      # free: merges leading dims

    # Static contraction-order choice (per-channel MXU FLOPs of the two orders).
    cost_wy_first = out_hp * w_img * (h_img + out_wp)
    cost_wx_first = h_img * out_wp * (w_img + out_hp)
    wy_first = cost_wy_first <= cost_wx_first

    vmem_limit, num_tc = _tpu_config()
    m_blk, steps, m_pad = _plan_blocks(
        m_total, h_img, w_img, out_hp, out_wp,
        in_itemsize, in_itemsize, compute_itemsize,
        wy_first, vmem_limit, num_tc)

    if m_pad != m_total:                          # zero channels, sliced off later
        x = jnp.pad(x, ((0, m_pad - m_total), (0, 0), (0, 0)))

    kernel = _make_kernel(m_blk, img.dtype, compute_dtype, wy_first,
                          unroll=(m_blk <= 8))

    flops_per_m = (2 * (out_hp * h_img * w_img + out_hp * w_img * out_wp)
                   if wy_first else
                   2 * (h_img * w_img * out_wp + out_hp * h_img * out_wp))
    cost = pl.CostEstimate(
        flops=int(m_pad * flops_per_m),
        transcendentals=0,
        bytes_accessed=int(m_pad * h_img * w_img * in_itemsize
                           + m_pad * out_hp * out_wp * in_itemsize
                           + (out_hp * h_img + w_img * out_wp) * compute_itemsize))

    out_p = pl.pallas_call(
        kernel,
        out_shape=jax.ShapeDtypeStruct((m_pad, out_hp, out_wp), img.dtype),
        grid_spec=pltpu.PrefetchScalarGridSpec(
            num_scalar_prefetch=0,
            grid=(steps,),
            in_specs=[
                pl.BlockSpec((out_hp, h_img), lambda i: (0, 0)),            # Wy
                pl.BlockSpec((m_blk, h_img, w_img), lambda i: (i, 0, 0)),   # img
                pl.BlockSpec((w_img, out_wp), lambda i: (0, 0)),            # Wx^T
            ],
            out_specs=pl.BlockSpec((m_blk, out_hp, out_wp), lambda i: (i, 0, 0)),
        ),
        compiler_params=pltpu.CompilerParams(
            dimension_semantics=("parallel",),
            vmem_limit_bytes=vmem_limit,
        ),
        cost_estimate=cost,
    )(wy, x, wxt)

    out = out_p[:m_total, :out_h, :out_w]
    return out.reshape(lead + (out_h, out_w))


def resized_crop_pallas(img, top, left, height, width, size,
                        compute_dtype=jnp.bfloat16):
    """Crop img[..., top:top+height, left:left+width] and bilinear-resize to
    `size` (align_corners=False, antialias=False).  Shape-stable across crop
    parameters, so repeated calls hit the jit/pallas cache (no recompiles)."""
    if isinstance(size, int):
        size = (size, size)
    if len(size) == 1:
        size = (size[0], size[0])
    out_h, out_w = int(size[0]), int(size[1])
    h_img, w_img = int(img.shape[-2]), int(img.shape[-1])
    out_hp = _round_up(out_h, _SUBLANE)   # sublane-aligned per-channel stores
    out_wp = _round_up(out_w, _LANE)      # lane-dense output slab
    wy = jnp.asarray(_crop_bilinear_matrix(h_img, top, height, out_h, out_hp),
                     dtype=compute_dtype)
    wxt = jnp.asarray(_crop_bilinear_matrix(w_img, left, width, out_w, out_wp).T,
                      dtype=compute_dtype)
    return _crop_resize_core(img, wy, wxt, out_h=out_h, out_w=out_w)


class MyRandomResizedCropPallas:
    """Pallas/JAX equivalent of MyRandomResizedCrop (bilinear, antialias=False)."""

    def __init__(self, size, scale=(0.08, 1.0), ratio=(3.0 / 4.0, 4.0 / 3.0), seed=0):
        if isinstance(size, int):
            size = (size, size)
        if len(size) == 1:
            size = (size[0], size[0])
        self.size = (int(size[0]), int(size[1]))
        self.scale = scale
        self.ratio = ratio
        self._rng = np.random.default_rng(seed)

    def __call__(self, img):
        h_in, w_in = img.shape[-2], img.shape[-1]
        i, j, h, w = _get_params(h_in, w_in, self.scale, self.ratio, self._rng)
        return resized_crop_pallas(img, i, j, h, w, self.size)


if __name__ == "__main__":
    key = jax.random.PRNGKey(0)
    x = jax.random.uniform(key, (2, 4, 16, 16), dtype=jnp.float32)

    scale = (0.08, 1.0)
    ratio = (3.0 / 4.0, 4.0 / 3.0)
    size = (8, 8)

    # Sample crop params deterministically on the host (same algorithm as get_params).
    rng = np.random.default_rng(0)
    i, j, h, w = _get_params(x.shape[-2], x.shape[-1], scale, ratio, rng)

    out = jax.block_until_ready(resized_crop_pallas(x, i, j, h, w, size))
    assert out.shape == (2, 4, size[0], size[1])
    assert out.dtype == x.dtype

    # Host reference for the same crop box (exact f32 bilinear, align_corners=False).
    # Tolerance accounts for bf16 matmul operands (<~1% for values in [0,1]).
    crop_np = np.asarray(x)[:, :, i:i + h, j:j + w].astype(np.float32)
    wy_np = _plain_bilinear_matrix(h, size[0])
    wx_np = _plain_bilinear_matrix(w, size[1])
    ref = np.einsum('oh,nchw,pw->ncop', wy_np, crop_np, wx_np)
    np.testing.assert_allclose(np.asarray(out), ref, rtol=3e-2, atol=3e-2)

    # A second call with a fresh random crop: identical shapes -> jit cache hit.
    crop_module = MyRandomResizedCropPallas(size, scale, ratio, seed=1)
    out2 = jax.block_until_ready(crop_module(x))
    assert out2.shape == (2, 4, size[0], size[1])

    # Also exercise the Wx-first contraction order and the upsampling path.
    x2 = jax.random.uniform(jax.random.PRNGKey(1), (1, 2, 8, 256), dtype=jnp.float32)
    i2, j2, h2, w2 = 2, 30, 5, 200
    out3 = jax.block_until_ready(resized_crop_pallas(x2, i2, j2, h2, w2, (128, 8)))
    crop2_np = np.asarray(x2)[:, :, i2:i2 + h2, j2:j2 + w2].astype(np.float32)
    ref3 = np.einsum('oh,nchw,pw->ncop',
                     _plain_bilinear_matrix(h2, 128), crop2_np,
                     _plain_bilinear_matrix(w2, 8))
    np.testing.assert_allclose(np.asarray(out3), ref3, rtol=3e-2, atol=3e-2)

    print("KERNEL_OK")
</pallas_src>

<mosaic_0001>
module attributes {stable_mosaic.version = 11 : i64} {
  func.func @kernel(%arg0: i32, %arg1: memref<8x16xbf16, #tpu.memory_space<vmem>>, %arg2: memref<8x16x16xf32, #tpu.memory_space<vmem>>, %arg3: memref<16x128xbf16, #tpu.memory_space<vmem>>, %arg4: memref<8x8x128xf32, #tpu.memory_space<vmem>>) attributes {dimension_semantics = [#tpu.dimension_semantics<parallel>], iteration_bounds = array<i64: 1>, scalar_prefetch = 0 : i64, scratch_operands = 0 : i64, tpu.core_type = #tpu.core_type<tc>, window_params = [{pipeline_mode = #tpu.pipeline_mode<synchronous>, transform_indices = @transform_0, window_bounds = array<i64: 8, 16>}, {transform_indices = @transform_1, window_bounds = array<i64: 8, 16, 16>}, {pipeline_mode = #tpu.pipeline_mode<synchronous>, transform_indices = @transform_2, window_bounds = array<i64: 16, 128>}, {transform_indices = @transform_3, window_bounds = array<i64: 8, 8, 128>}]} {
    %c0 = arith.constant 0 : index
    %c0_0 = arith.constant 0 : index
    %0 = vector.load %arg1[%c0, %c0_0] : memref<8x16xbf16, #tpu.memory_space<vmem>>, vector<8x16xbf16>
    %c0_1 = arith.constant 0 : index
    %c0_2 = arith.constant 0 : index
    %1 = vector.load %arg3[%c0_1, %c0_2] : memref<16x128xbf16, #tpu.memory_space<vmem>>, vector<16x128xbf16>
    %c0_i32 = arith.constant 0 : i32
    %2 = arith.index_cast %c0_i32 : i32 to index
    %c0_3 = arith.constant 0 : index
    %c0_4 = arith.constant 0 : index
    %3 = vector.load %arg2[%2, %c0_3, %c0_4] : memref<8x16x16xf32, #tpu.memory_space<vmem>>, vector<1x16x16xf32>
    %4 = vector.shape_cast %3 : vector<1x16x16xf32> to vector<16x16xf32>
    %5 = arith.truncf %4 : vector<16x16xf32> to vector<16x16xbf16>
    %cst = arith.constant dense<0.000000e+00> : vector<8x16xf32>
    %6 = tpu.matmul %0, %5, %cst {dimension_numbers = #tpu.dot_dimension_numbers<[1], [0], [0], [1], [0, 0, 1, 1], [], []>} : vector<8x16xbf16>, vector<16x16xbf16>, vector<8x16xf32> -> vector<8x16xf32>
    %7 = arith.truncf %6 : vector<8x16xf32> to vector<8x16xbf16>
    %cst_5 = arith.constant dense<0.000000e+00> : vector<8x128xf32>
    %8 = tpu.matmul %7, %1, %cst_5 {dimension_numbers = #tpu.dot_dimension_numbers<[1], [0], [0], [1], [0, 0, 1, 1], [], []>} : vector<8x16xbf16>, vector<16x128xbf16>, vector<8x128xf32> -> vector<8x128xf32>
    %9 = arith.index_cast %c0_i32 : i32 to index
    %c0_6 = arith.constant 0 : index
    %c0_7 = arith.constant 0 : index
    %10 = vector.load %arg4[%9, %c0_6, %c0_7] : memref<8x8x128xf32, #tpu.memory_space<vmem>>, vector<1x8x128xf32>
    %11 = vector.shape_cast %10 : vector<1x8x128xf32> to vector<8x128xf32>
    %12 = vector.shape_cast %8 : vector<8x128xf32> to vector<1x8x128xf32>
    tpu.vector_store %arg4[%9, %c0_6, %c0_7], %12 {strides = array<i32>} : memref<8x8x128xf32, #tpu.memory_space<vmem>>, vector<1x8x128xf32>,
    %c1_i32 = arith.constant 1 : i32
    %13 = arith.index_cast %c1_i32 : i32 to index
    %c0_8 = arith.constant 0 : index
    %c0_9 = arith.constant 0 : index
    %14 = vector.load %arg2[%13, %c0_8, %c0_9] : memref<8x16x16xf32, #tpu.memory_space<vmem>>, vector<1x16x16xf32>
    %15 = vector.shape_cast %14 : vector<1x16x16xf32> to vector<16x16xf32>
    %16 = arith.truncf %15 : vector<16x16xf32> to vector<16x16xbf16>
    %cst_10 = arith.constant dense<0.000000e+00> : vector<8x16xf32>
    %17 = tpu.matmul %0, %16, %cst_10 {dimension_numbers = #tpu.dot_dimension_numbers<[1], [0], [0], [1], [0, 0, 1, 1], [], []>} : vector<8x16xbf16>, vector<16x16xbf16>, vector<8x16xf32> -> vector<8x16xf32>
    %18 = arith.truncf %17 : vector<8x16xf32> to vector<8x16xbf16>
    %cst_11 = arith.constant dense<0.000000e+00> : vector<8x128xf32>
    %19 = tpu.matmul %18, %1, %cst_11 {dimension_numbers = #tpu.dot_dimension_numbers<[1], [0], [0], [1], [0, 0, 1, 1], [], []>} : vector<8x16xbf16>, vector<16x128xbf16>, vector<8x128xf32> -> vector<8x128xf32>
    %20 = arith.index_cast %c1_i32 : i32 to index
    %c0_12 = arith.constant 0 : index
    %c0_13 = arith.constant 0 : index
    %21 = vector.load %arg4[%20, %c0_12, %c0_13] : memref<8x8x128xf32, #tpu.memory_space<vmem>>, vector<1x8x128xf32>
    %22 = vector.shape_cast %21 : vector<1x8x128xf32> to vector<8x128xf32>
    %23 = vector.shape_cast %19 : vector<8x128xf32> to vector<1x8x128xf32>
    tpu.vector_store %arg4[%20, %c0_12, %c0_13], %23 {strides = array<i32>} : memref<8x8x128xf32, #tpu.memory_space<vmem>>, vector<1x8x128xf32>,
    %c2_i32 = arith.constant 2 : i32
    %24 = arith.index_cast %c2_i32 : i32 to index
    %c0_14 = arith.constant 0 : index
    %c0_15 = arith.constant 0 : index
    %25 = vector.load %arg2[%24, %c0_14, %c0_15] : memref<8x16x16xf32, #tpu.memory_space<vmem>>, vector<1x16x16xf32>
    %26 = vector.shape_cast %25 : vector<1x16x16xf32> to vector<16x16xf32>
    %27 = arith.truncf %26 : vector<16x16xf32> to vector<16x16xbf16>
    %cst_16 = arith.constant dense<0.000000e+00> : vector<8x16xf32>
    %28 = tpu.matmul %0, %27, %cst_16 {dimension_numbers = #tpu.dot_dimension_numbers<[1], [0], [0], [1], [0, 0, 1, 1], [], []>} : vector<8x16xbf16>, vector<16x16xbf16>, vector<8x16xf32> -> vector<8x16xf32>
    %29 = arith.truncf %28 : vector<8x16xf32> to vector<8x16xbf16>
    %cst_17 = arith.constant dense<0.000000e+00> : vector<8x128xf32>
    %30 = tpu.matmul %29, %1, %cst_17 {dimension_numbers = #tpu.dot_dimension_numbers<[1], [0], [0], [1], [0, 0, 1, 1], [], []>} : vector<8x16xbf16>, vector<16x128xbf16>, vector<8x128xf32> -> vector<8x128xf32>
    %31 = arith.index_cast %c2_i32 : i32 to index
    %c0_18 = arith.constant 0 : index
    %c0_19 = arith.constant 0 : index
    %32 = vector.load %arg4[%31, %c0_18, %c0_19] : memref<8x8x128xf32, #tpu.memory_space<vmem>>, vector<1x8x128xf32>
    %33 = vector.shape_cast %32 : vector<1x8x128xf32> to vector<8x128xf32>
    %34 = vector.shape_cast %30 : vector<8x128xf32> to vector<1x8x128xf32>
    tpu.vector_store %arg4[%31, %c0_18, %c0_19], %34 {strides = array<i32>} : memref<8x8x128xf32, #tpu.memory_space<vmem>>, vector<1x8x128xf32>,
    %c3_i32 = arith.constant 3 : i32
    %35 = arith.index_cast %c3_i32 : i32 to index
    %c0_20 = arith.constant 0 : index
    %c0_21 = arith.constant 0 : index
    %36 = vector.load %arg2[%35, %c0_20, %c0_21] : memref<8x16x16xf32, #tpu.memory_space<vmem>>, vector<1x16x16xf32>
    %37 = vector.shape_cast %36 : vector<1x16x16xf32> to vector<16x16xf32>
    %38 = arith.truncf %37 : vector<16x16xf32> to vector<16x16xbf16>
    %cst_22 = arith.constant dense<0.000000e+00> : vector<8x16xf32>
    %39 = tpu.matmul %0, %38, %cst_22 {dimension_numbers = #tpu.dot_dimension_numbers<[1], [0], [0], [1], [0, 0, 1, 1], [], []>} : vector<8x16xbf16>, vector<16x16xbf16>, vector<8x16xf32> -> vector<8x16xf32>
    %40 = arith.truncf %39 : vector<8x16xf32> to vector<8x16xbf16>
    %cst_23 = arith.constant dense<0.000000e+00> : vector<8x128xf32>
    %41 = tpu.matmul %40, %1, %cst_23 {dimension_numbers = #tpu.dot_dimension_numbers<[1], [0], [0], [1], [0, 0, 1, 1], [], []>} : vector<8x16xbf16>, vector<16x128xbf16>, vector<8x128xf32> -> vector<8x128xf32>
    %42 = arith.index_cast %c3_i32 : i32 to index
    %c0_24 = arith.constant 0 : index
    %c0_25 = arith.constant 0 : index
    %43 = vector.load %arg4[%42, %c0_24, %c0_25] : memref<8x8x128xf32, #tpu.memory_space<vmem>>, vector<1x8x128xf32>
    %44 = vector.shape_cast %43 : vector<1x8x128xf32> to vector<8x128xf32>
    %45 = vector.shape_cast %41 : vector<8x128xf32> to vector<1x8x128xf32>
    tpu.vector_store %arg4[%42, %c0_24, %c0_25], %45 {strides = array<i32>} : memref<8x8x128xf32, #tpu.memory_space<vmem>>, vector<1x8x128xf32>,
    %c4_i32 = arith.constant 4 : i32
    %46 = arith.index_cast %c4_i32 : i32 to index
    %c0_26 = arith.constant 0 : index
    %c0_27 = arith.constant 0 : index
    %47 = vector.load %arg2[%46, %c0_26, %c0_27] : memref<8x16x16xf32, #tpu.memory_space<vmem>>, vector<1x16x16xf32>
    %48 = vector.shape_cast %47 : vector<1x16x16xf32> to vector<16x16xf32>
    %49 = arith.truncf %48 : vector<16x16xf32> to vector<16x16xbf16>
    %cst_28 = arith.constant dense<0.000000e+00> : vector<8x16xf32>
    %50 = tpu.matmul %0, %49, %cst_28 {dimension_numbers = #tpu.dot_dimension_numbers<[1], [0], [0], [1], [0, 0, 1, 1], [], []>} : vector<8x16xbf16>, vector<16x16xbf16>, vector<8x16xf32> -> vector<8x16xf32>
    %51 = arith.truncf %50 : vector<8x16xf32> to vector<8x16xbf16>
    %cst_29 = arith.constant dense<0.000000e+00> : vector<8x128xf32>
    %52 = tpu.matmul %51, %1, %cst_29 {dimension_numbers = #tpu.dot_dimension_numbers<[1], [0], [0], [1], [0, 0, 1, 1], [], []>} : vector<8x16xbf16>, vector<16x128xbf16>, vector<8x128xf32> -> vector<8x128xf32>
    %53 = arith.index_cast %c4_i32 : i32 to index
    %c0_30 = arith.constant 0 : index
    %c0_31 = arith.constant 0 : index
    %54 = vector.load %arg4[%53, %c0_30, %c0_31] : memref<8x8x128xf32, #tpu.memory_space<vmem>>, vector<1x8x128xf32>
    %55 = vector.shape_cast %54 : vector<1x8x128xf32> to vector<8x128xf32>
    %56 = vector.shape_cast %52 : vector<8x128xf32> to vector<1x8x128xf32>
    tpu.vector_store %arg4[%53, %c0_30, %c0_31], %56 {strides = array<i32>} : memref<8x8x128xf32, #tpu.memory_space<vmem>>, vector<1x8x128xf32>,
    %c5_i32 = arith.constant 5 : i32
    %57 = arith.index_cast %c5_i32 : i32 to index
    %c0_32 = arith.constant 0 : index
    %c0_33 = arith.constant 0 : index
    %58 = vector.load %arg2[%57, %c0_32, %c0_33] : memref<8x16x16xf32, #tpu.memory_space<vmem>>, vector<1x16x16xf32>
    %59 = vector.shape_cast %58 : vector<1x16x16xf32> to vector<16x16xf32>
    %60 = arith.truncf %59 : vector<16x16xf32> to vector<16x16xbf16>
    %cst_34 = arith.constant dense<0.000000e+00> : vector<8x16xf32>
    %61 = tpu.matmul %0, %60, %cst_34 {dimension_numbers = #tpu.dot_dimension_numbers<[1], [0], [0], [1], [0, 0, 1, 1], [], []>} : vector<8x16xbf16>, vector<16x16xbf16>, vector<8x16xf32> -> vector<8x16xf32>
    %62 = arith.truncf %61 : vector<8x16xf32> to vector<8x16xbf16>
    %cst_35 = arith.constant dense<0.000000e+00> : vector<8x128xf32>
    %63 = tpu.matmul %62, %1, %cst_35 {dimension_numbers = #tpu.dot_dimension_numbers<[1], [0], [0], [1], [0, 0, 1, 1], [], []>} : vector<8x16xbf16>, vector<16x128xbf16>, vector<8x128xf32> -> vector<8x128xf32>
    %64 = arith.index_cast %c5_i32 : i32 to index
    %c0_36 = arith.constant 0 : index
    %c0_37 = arith.constant 0 : index
    %65 = vector.load %arg4[%64, %c0_36, %c0_37] : memref<8x8x128xf32, #tpu.memory_space<vmem>>, vector<1x8x128xf32>
    %66 = vector.shape_cast %65 : vector<1x8x128xf32> to vector<8x128xf32>
    %67 = vector.shape_cast %63 : vector<8x128xf32> to vector<1x8x128xf32>
    tpu.vector_store %arg4[%64, %c0_36, %c0_37], %67 {strides = array<i32>} : memref<8x8x128xf32, #tpu.memory_space<vmem>>, vector<1x8x128xf32>,
    %c6_i32 = arith.constant 6 : i32
    %68 = arith.index_cast %c6_i32 : i32 to index
    %c0_38 = arith.constant 0 : index
    %c0_39 = arith.constant 0 : index
    %69 = vector.load %arg2[%68, %c0_38, %c0_39] : memref<8x16x16xf32, #tpu.memory_space<vmem>>, vector<1x16x16xf32>
    %70 = vector.shape_cast %69 : vector<1x16x16xf32> to vector<16x16xf32>
    %71 = arith.truncf %70 : vector<16x16xf32> to vector<16x16xbf16>
    %cst_40 = arith.constant dense<0.000000e+00> : vector<8x16xf32>
    %72 = tpu.matmul %0, %71, %cst_40 {dimension_numbers = #tpu.dot_dimension_numbers<[1], [0], [0], [1], [0, 0, 1, 1], [], []>} : vector<8x16xbf16>, vector<16x16xbf16>, vector<8x16xf32> -> vector<8x16xf32>
    %73 = arith.truncf %72 : vector<8x16xf32> to vector<8x16xbf16>
    %cst_41 = arith.constant dense<0.000000e+00> : vector<8x128xf32>
    %74 = tpu.matmul %73, %1, %cst_41 {dimension_numbers = #tpu.dot_dimension_numbers<[1], [0], [0], [1], [0, 0, 1, 1], [], []>} : vector<8x16xbf16>, vector<16x128xbf16>, vector<8x128xf32> -> vector<8x128xf32>
    %75 = arith.index_cast %c6_i32 : i32 to index
    %c0_42 = arith.constant 0 : index
    %c0_43 = arith.constant 0 : index
    %76 = vector.load %arg4[%75, %c0_42, %c0_43] : memref<8x8x128xf32, #tpu.memory_space<vmem>>, vector<1x8x128xf32>
    %77 = vector.shape_cast %76 : vector<1x8x128xf32> to vector<8x128xf32>
    %78 = vector.shape_cast %74 : vector<8x128xf32> to vector<1x8x128xf32>
    tpu.vector_store %arg4[%75, %c0_42, %c0_43], %78 {strides = array<i32>} : memref<8x8x128xf32, #tpu.memory_space<vmem>>, vector<1x8x128xf32>,
    %c7_i32 = arith.constant 7 : i32
    %79 = arith.index_cast %c7_i32 : i32 to index
    %c0_44 = arith.constant 0 : index
    %c0_45 = arith.constant 0 : index
    %80 = vector.load %arg2[%79, %c0_44, %c0_45] : memref<8x16x16xf32, #tpu.memory_space<vmem>>, vector<1x16x16xf32>
    %81 = vector.shape_cast %80 : vector<1x16x16xf32> to vector<16x16xf32>
    %82 = arith.truncf %81 : vector<16x16xf32> to vector<16x16xbf16>
    %cst_46 = arith.constant dense<0.000000e+00> : vector<8x16xf32>
    %83 = tpu.matmul %0, %82, %cst_46 {dimension_numbers = #tpu.dot_dimension_numbers<[1], [0], [0], [1], [0, 0, 1, 1], [], []>} : vector<8x16xbf16>, vector<16x16xbf16>, vector<8x16xf32> -> vector<8x16xf32>
    %84 = arith.truncf %83 : vector<8x16xf32> to vector<8x16xbf16>
    %cst_47 = arith.constant dense<0.000000e+00> : vector<8x128xf32>
    %85 = tpu.matmul %84, %1, %cst_47 {dimension_numbers = #tpu.dot_dimension_numbers<[1], [0], [0], [1], [0, 0, 1, 1], [], []>} : vector<8x16xbf16>, vector<16x128xbf16>, vector<8x128xf32> -> vector<8x128xf32>
    %86 = arith.index_cast %c7_i32 : i32 to index
    %c0_48 = arith.constant 0 : index
    %c0_49 = arith.constant 0 : index
    %87 = vector.load %arg4[%86, %c0_48, %c0_49] : memref<8x8x128xf32, #tpu.memory_space<vmem>>, vector<1x8x128xf32>
    %88 = vector.shape_cast %87 : vector<1x8x128xf32> to vector<8x128xf32>
    %89 = vector.shape_cast %85 : vector<8x128xf32> to vector<1x8x128xf32>
    tpu.vector_store %arg4[%86, %c0_48, %c0_49], %89 {strides = array<i32>} : memref<8x8x128xf32, #tpu.memory_space<vmem>>, vector<1x8x128xf32>,
    %c8_i32 = arith.constant 8 : i32
    return
  }
  func.func @transform_0(%arg0: i32) -> (i32, i32) {
    %c0_i32 = arith.constant 0 : i32
    %c0_i32_0 = arith.constant 0 : i32
    %c0_i32_1 = arith.constant 0 : i32
    return %c0_i32, %c0_i32_0 : i32, i32
  }
  func.func @transform_1(%arg0: i32) -> (i32, i32, i32) {
    %c0_i32 = arith.constant 0 : i32
    %c0_i32_0 = arith.constant 0 : i32
    %c0_i32_1 = arith.constant 0 : i32
    return %arg0, %c0_i32, %c0_i32_0 : i32, i32, i32
  }
  func.func @transform_2(%arg0: i32) -> (i32, i32) {
    %c0_i32 = arith.constant 0 : i32
    %c0_i32_0 = arith.constant 0 : i32
    %c0_i32_1 = arith.constant 0 : i32
    return %c0_i32, %c0_i32_0 : i32, i32
  }
  func.func @transform_3(%arg0: i32) -> (i32, i32, i32) {
    %c0_i32 = arith.constant 0 : i32
    %c0_i32_0 = arith.constant 0 : i32
    %c0_i32_1 = arith.constant 0 : i32
    return %arg0, %c0_i32, %c0_i32_0 : i32, i32, i32
  }
}

</mosaic_0001>

<bundles_post_ra>
// kernel: _crop_resize_core.1
= control target key start
LH: loop header
LB: loop body
LE: loop exit
PB: predicated region body
PF: predicated region fallthrough
CT: control target
= control target key end

     0   :  { %8 = vsyncpa [#allocation3], 0  ;;  %s1169_s0 = inlined_call_operand.hbm [shape: bf16[8,16], index: 0, kind: input, shape index: {}]   ;;  %s1170_s1 = inlined_call_operand.hbm [shape: f32[8,16,16], index: 1, kind: input, shape index: {}]   ;;  %s1171_s2 = inlined_call_operand.vmem [shape: bf16[16,128], index: 2, kind: input, shape index: {}]   ;;  %s1172_s3 = inlined_call_operand.hbm [shape: f32[8,8,128], index: 3, kind: output, shape index: {}]  }
   0x1   :  { %9 = vsyncpa [#allocation6], 0 }
   0x2   :  { %10 = vsyncpa [#allocation4], 0  ;;  %s1016_s12 = smov [#allocation2]   ;;  %s1017_s14 = smov [#allocation5]  }
   0x3   :  { %s17_s13 = sshll.u32 %s1016_s12, 4  ;;  %s26_s15 = sshll.u32 %s1017_s14, 4  ;;  %s18_s13 = int_to_ptr.vmem [resolvable:$true] %s17_s13  ;;  %s1043_s15 = int_to_ptr.vmem [resolvable:$true] %s26_s15 }
   0x4   :  { %s944_s18 = scalar_lea.hbm %s1169_s0, 64 }
   0x5   :  { %p945_p0 = scmp.ne.s32.totalorder %s1169_s0, %s944_s18  ;;  %p948_p1 = scmp.lt.u32.totalorder %s944_s18, %s1169_s0 }
   0x7   :  { %p950_p2 = pnand %p948_p1, %p945_p0 }
   0x9   :  { %953 = shalt.err (!%p950_p2)
}
   0xa   :  { %s954_s23 = scalar_lea.vmem %s18_s13, 64  ;;  %p959_p4 = scmp.lt.s32.totalorder %s18_s13, %s18_s13 }
   0xb   :  { %p955_p3 = scmp.ne.s32.totalorder %s18_s13, %s954_s23  ;;  %p960_p5 = scmp.lt.s32.totalorder %s954_s23, %s954_s23 }
   0xd   :  { %p961_p6 = por %p960_p5, %p959_p4 }
   0xf   :  { %p962_p7 = pnand %p961_p6, %p955_p3 }
  0x11   :  { %965 = shalt.err (!%p962_p7)
}
  0x12   :  { %20 = dma.hbm_to_vmem [thread:$0]  %s1169_s0, 64, %s18_s13, [#allocation3]  }
  0x13   :  { %s966_s28 = scalar_lea.hbm %s1170_s1, 2048 }
  0x14   :  { %p967_p8 = scmp.ne.s32.totalorder %s1170_s1, %s966_s28  ;;  %p970_p9 = scmp.lt.u32.totalorder %s966_s28, %s1170_s1 }
  0x16   :  { %p972_p10 = pnand %p970_p9, %p967_p8 }
  0x18   :  { %975 = shalt.err (!%p972_p10)
}
  0x19   :  { %s976_s6 = scalar_lea.vmem %s1043_s15, 2048  ;;  %p981_p12 = scmp.lt.s32.totalorder %s1043_s15, %s1043_s15 }
  0x1a   :  { %p977_p11 = scmp.ne.s32.totalorder %s1043_s15, %s976_s6  ;;  %p982_p13 = scmp.lt.s32.totalorder %s976_s6, %s976_s6 }
  0x1c   :  { %p983_p0 = por %p982_p13, %p981_p12 }
  0x1e   :  { %p984_p1 = pnand %p983_p0, %p977_p11 }
  0x20   :  { %987 = shalt.err (!%p984_p1)
}
  0x21   :  { %s1018_s0 = smov 128   ;;  %s1019_s7 = smov 8  }
  0x22   :  { %32 = dma.hbm_to_vmem [thread:$0]  %s1170_s1, 2048, %s1043_s15, [#allocation6], %s1018_s0, %s1018_s0, %s1019_s7  }
  0x23   :  { %1010 = dma.done.wait [#allocation3], 64  }
  0x24   :  { %1011 = vsyncadd [#allocation3], 4294967232 }
  0x25   :  { %1012 = dma.done.wait [#allocation6], 2048  }
  0x26   :  { %1013 = vsyncadd [#allocation6], 4294965248  ;;  %v1020_v0 = vmov 0.0   ;;  %vm1021_vm0 = vmmov 0   ;;  %v45_v1 = vld [vmem:[#allocation5] sm:$0xff]  ;;  %v46_v2 = vld [vmem:[#allocation5 + $0x8] sm:$0xff] }
  0x27   :  { %840 = vmatprep.subr.bf16.mxu0 %v1020_v0  ;;  %842 = vmatprep.mubr.msk.bf16.mxu0 %vm1021_vm0, %v1020_v0  ;;  %v47_v3 = vpack.c.bf16 %v46_v2, %v45_v1  ;;  %v144_v4 = vld [vmem:[#allocation5 + $0x10] sm:$0xff]  ;;  %v145_v5 = vld [vmem:[#allocation5 + $0x18] sm:$0xff]  ;;  %vm48_vm1 = vcmask 130048   ;;  %v234_v8 = vld [vmem:[#allocation5 + $0x20] sm:$0xff] }
  0x28   :  { %846 = vmatprep.subr.bf16.mxu1 %v1020_v0  ;;  %848 = vmatprep.mubr.msk.bf16.mxu1 %vm1021_vm0, %v1020_v0  ;;  %v42_v6 = vld [vmem:[#allocation2] sm:$0xf]  ;;  %v146_v7 = vpack.c.bf16 %v145_v5, %v144_v4  ;;  %v235_v9 = vld [vmem:[#allocation5 + $0x28] sm:$0xff]  ;;  %v324_v11 = vld [vmem:[#allocation5 + $0x30] sm:$0xff] }
  0x29   :  { %841 = vmatpush3.bf16.msra.mxu0 %v47_v3  ;;  %v236_v10 = vpack.c.bf16 %v235_v9, %v234_v8  ;;  %v325_v12 = vld [vmem:[#allocation5 + $0x38] sm:$0xff]  ;;  %v414_v14 = vld [vmem:[#allocation5 + $0x40] sm:$0xff]  ;;  %v415_v15 = vld [vmem:[#allocation5 + $0x48] sm:$0xff] }
  0x2a   :  { %852 = vmatprep.subr.bf16.mxu0 %v1020_v0  ;;  %v326_v13 = vpack.c.bf16 %v325_v12, %v324_v11  ;;  %v416_v16 = vpack.c.bf16 %v415_v15, %v414_v14  ;;  %v504_v17 = vld [vmem:[#allocation5 + $0x50] sm:$0xff]  ;;  %v505_v18 = vld [vmem:[#allocation5 + $0x58] sm:$0xff]  ;;  %v594_v20 = vld [vmem:[#allocation5 + $0x60] sm:$0xff] }
  0x2b   :  { %v506_v19 = vpack.c.bf16 %v505_v18, %v504_v17  ;;  %v595_v21 = vld [vmem:[#allocation5 + $0x68] sm:$0xff]  ;;  %v684_v23 = vld [vmem:[#allocation5 + $0x70] sm:$0xff]  ;;  %v685_v24 = vld [vmem:[#allocation5 + $0x78] sm:$0xff] }
  0x2c   :  { %843 = vmatmul.mubr.msk.bf16.vlgmr.msra.gmra.mrb[0].mxu0 %vm48_vm1, %v42_v6  ;;  %v596_v22 = vpack.c.bf16 %v595_v21, %v594_v20  ;;  %v686_v25 = vpack.c.bf16 %v685_v24, %v684_v23  ;;  %v1115_v26 = vld [vmem:[%s1171_s2] sm:$0xff]   ;;  %s1022_s2 = smov [#allocation7]  }
  0x2d   :  { %853 = vmatpush3.bf16.msra.mxu0 %v146_v7  ;;  %854 = vmatprep.mubr.msk.bf16.mxu0 %vm1021_vm0, %v1020_v0  ;;  %s778_s11 = sshll.u32 %s1022_s2, 4  ;;  %s779_s11 = int_to_ptr.vmem [resolvable:$true] %s778_s11 }
  0x2e   :  { %864 = vmatprep.subr.bf16.mxu0 %v1020_v0  ;;  %847 = vmatpush3.bf16.msra.mxu1 %v1115_v26  ;;  %s988_s12 = scalar_lea.vmem %s779_s11, 1024  ;;  %p993_p3 = scmp.lt.s32.totalorder %s779_s11, %s779_s11 }
  0x2f   :  { %858 = vmatprep.subr.bf16.mxu1 %v1020_v0  ;;  %p989_p2 = scmp.ne.s32.totalorder %s779_s11, %s988_s12  ;;  %p994_p4 = scmp.lt.s32.totalorder %s988_s12, %s988_s12 }
  0x31   :  { %p995_p5 = por %p994_p4, %p993_p3 }
  0x33   :  { %p996_p6 = pnand %p995_p5, %p989_p2 }
  0x34   :  { %855 = vmatmul.mubr.msk.bf16.vlgmr.msra.gmra.mrb[4].mxu0 %vm48_vm1, %v42_v6 }
  0x35   :  { %865 = vmatpush3.bf16.msra.mxu0 %v236_v10  ;;  %866 = vmatprep.mubr.msk.bf16.mxu0 %vm1021_vm0, %v1020_v0 }
  0x36   :  { %876 = vmatprep.subr.bf16.mxu0 %v1020_v0 }
  0x3c   :  { %867 = vmatmul.mubr.msk.bf16.vlgmr.msra.gmra.mrb[8].mxu0 %vm48_vm1, %v42_v6 }
  0x3d   :  { %877 = vmatpush3.bf16.msra.mxu0 %v326_v13  ;;  %878 = vmatprep.mubr.msk.bf16.mxu0 %vm1021_vm0, %v1020_v0 }
  0x3e   :  { %888 = vmatprep.subr.bf16.mxu0 %v1020_v0 }
  0x44   :  { %879 = vmatmul.mubr.msk.bf16.vlgmr.msra.gmra.mrb[12].mxu0 %vm48_vm1, %v42_v6 }
  0x45   :  { %889 = vmatpush3.bf16.msra.mxu0 %v416_v16  ;;  %890 = vmatprep.mubr.msk.bf16.mxu0 %vm1021_vm0, %v1020_v0 }
  0x46   :  { %900 = vmatprep.subr.bf16.mxu0 %v1020_v0 }
  0x4c   :  { %891 = vmatmul.mubr.msk.bf16.vlgmr.msra.gmra.mrb[16].mxu0 %vm48_vm1, %v42_v6 }
  0x4d   :  { %901 = vmatpush3.bf16.msra.mxu0 %v506_v19  ;;  %902 = vmatprep.mubr.msk.bf16.mxu0 %vm1021_vm0, %v1020_v0 }
  0x4e   :  { %912 = vmatprep.subr.bf16.mxu0 %v1020_v0 }
  0x54   :  { %903 = vmatmul.mubr.msk.bf16.vlgmr.msra.gmra.mrb[20].mxu0 %vm48_vm1, %v42_v6 }
  0x55   :  { %913 = vmatpush3.bf16.msra.mxu0 %v596_v22  ;;  %914 = vmatprep.mubr.msk.bf16.mxu0 %vm1021_vm0, %v1020_v0 }
  0x56   :  { %924 = vmatprep.subr.bf16.mxu0 %v1020_v0 }
  0x5c   :  { %915 = vmatmul.mubr.msk.bf16.vlgmr.msra.gmra.mrb[24].mxu0 %vm48_vm1, %v42_v6 }
  0x5d   :  { %925 = vmatpush3.bf16.msra.mxu0 %v686_v25  ;;  %926 = vmatprep.mubr.msk.bf16.mxu0 %vm1021_vm0, %v1020_v0 }
  0x64   :  { %927 = vmatmul.mubr.msk.bf16.vlgmr.msra.gmra.mrb[28].mxu0 %vm48_vm1, %v42_v6 }
  0xff   :  { %v86_v27 = vpop.f32.mrb[0].mxu0 }
 0x100   :  { %v92_v28 = vpack.c.bf16 %v86_v27, %v86_v27  ;;  %v844_v29 = vpop.f32.mrb[1].mxu0 }
 0x101   :  { %v89_v30 = vpop.f32.mrb[2].mxu0 }
 0x102   :  { %v845_v31 = vpop.f32.mrb[3].mxu0  ;;  %849 = vmatmul.mubr.msk.bf16.vlgmr.msra.gmra.mrb[0].mxu1 %vm48_vm1, %v92_v28 }
 0x103   :  { %859 = vmatpush3.bf16.msra.mxu1 %v1115_v26  ;;  %860 = vmatprep.mubr.msk.bf16.mxu1 %vm1021_vm0, %v1020_v0 }
 0x104   :  { %870 = vmatprep.subr.bf16.mxu1 %v1020_v0 }
 0x107   :  { %v181_v32 = vpop.f32.mrb[4].mxu0 }
 0x108   :  { %v187_v33 = vpack.c.bf16 %v181_v32, %v181_v32  ;;  %v856_v34 = vpop.f32.mrb[5].mxu0 }
 0x109   :  { %v184_v35 = vpop.f32.mrb[6].mxu0 }
 0x10a   :  { %v857_v36 = vpop.f32.mrb[7].mxu0  ;;  %861 = vmatmul.mubr.msk.bf16.vlgmr.msra.gmra.mrb[4].mxu1 %vm48_vm1, %v187_v33 }
 0x10b   :  { %871 = vmatpush3.bf16.msra.mxu1 %v1115_v26  ;;  %872 = vmatprep.mubr.msk.bf16.mxu1 %vm1021_vm0, %v1020_v0 }
 0x10c   :  { %882 = vmatprep.subr.bf16.mxu1 %v1020_v0 }
 0x10f   :  { %v271_v37 = vpop.f32.mrb[8].mxu0 }
 0x110   :  { %v277_v38 = vpack.c.bf16 %v271_v37, %v271_v37  ;;  %v868_v39 = vpop.f32.mrb[9].mxu0 }
 0x111   :  { %v274_v40 = vpop.f32.mrb[10].mxu0 }
 0x112   :  { %v869_v41 = vpop.f32.mrb[11].mxu0  ;;  %873 = vmatmul.mubr.msk.bf16.vlgmr.msra.gmra.mrb[8].mxu1 %vm48_vm1, %v277_v38 }
 0x113   :  { %883 = vmatpush3.bf16.msra.mxu1 %v1115_v26  ;;  %884 = vmatprep.mubr.msk.bf16.mxu1 %vm1021_vm0, %v1020_v0 }
 0x114   :  { %894 = vmatprep.subr.bf16.mxu1 %v1020_v0 }
 0x117   :  { %v361_v42 = vpop.f32.mrb[12].mxu0 }
 0x118   :  { %v367_v43 = vpack.c.bf16 %v361_v42, %v361_v42  ;;  %v880_v44 = vpop.f32.mrb[13].mxu0 }
 0x119   :  { %v364_v45 = vpop.f32.mrb[14].mxu0 }
 0x11a   :  { %v881_v46 = vpop.f32.mrb[15].mxu0  ;;  %885 = vmatmul.mubr.msk.bf16.vlgmr.msra.gmra.mrb[12].mxu1 %vm48_vm1, %v367_v43 }
 0x11b   :  { %895 = vmatpush3.bf16.msra.mxu1 %v1115_v26  ;;  %896 = vmatprep.mubr.msk.bf16.mxu1 %vm1021_vm0, %v1020_v0 }
 0x11c   :  { %906 = vmatprep.subr.bf16.mxu1 %v1020_v0 }
 0x11f   :  { %v451_v47 = vpop.f32.mrb[16].mxu0 }
 0x120   :  { %v457_v48 = vpack.c.bf16 %v451_v47, %v451_v47  ;;  %v892_v49 = vpop.f32.mrb[17].mxu0 }
 0x121   :  { %v454_v50 = vpop.f32.mrb[18].mxu0 }
 0x122   :  { %v893_v51 = vpop.f32.mrb[19].mxu0  ;;  %897 = vmatmul.mubr.msk.bf16.vlgmr.msra.gmra.mrb[16].mxu1 %vm48_vm1, %v457_v48 }
 0x123   :  { %907 = vmatpush3.bf16.msra.mxu1 %v1115_v26  ;;  %908 = vmatprep.mubr.msk.bf16.mxu1 %vm1021_vm0, %v1020_v0 }
 0x124   :  { %918 = vmatprep.subr.bf16.mxu1 %v1020_v0 }
 0x127   :  { %v541_v52 = vpop.f32.mrb[20].mxu0 }
 0x128   :  { %v547_v53 = vpack.c.bf16 %v541_v52, %v541_v52  ;;  %v904_v54 = vpop.f32.mrb[21].mxu0 }
 0x129   :  { %v544_v55 = vpop.f32.mrb[22].mxu0 }
 0x12a   :  { %v905_v56 = vpop.f32.mrb[23].mxu0  ;;  %909 = vmatmul.mubr.msk.bf16.vlgmr.msra.gmra.mrb[20].mxu1 %vm48_vm1, %v547_v53 }
 0x12b   :  { %919 = vmatpush3.bf16.msra.mxu1 %v1115_v26  ;;  %920 = vmatprep.mubr.msk.bf16.mxu1 %vm1021_vm0, %v1020_v0 }
 0x12c   :  { %930 = vmatprep.subr.bf16.mxu1 %v1020_v0 }
 0x12f   :  { %v631_v57 = vpop.f32.mrb[24].mxu0 }
 0x130   :  { %v637_v58 = vpack.c.bf16 %v631_v57, %v631_v57  ;;  %v916_v59 = vpop.f32.mrb[25].mxu0 }
 0x131   :  { %v634_v60 = vpop.f32.mrb[26].mxu0 }
 0x132   :  { %v917_v61 = vpop.f32.mrb[27].mxu0  ;;  %921 = vmatmul.mubr.msk.bf16.vlgmr.msra.gmra.mrb[24].mxu1 %vm48_vm1, %v637_v58 }
 0x133   :  { %931 = vmatpush3.bf16.msra.mxu1 %v1115_v26  ;;  %932 = vmatprep.mubr.msk.bf16.mxu1 %vm1021_vm0, %v1020_v0 }
 0x137   :  { %v721_v62 = vpop.f32.mrb[28].mxu0 }
 0x138   :  { %v727_v63 = vpack.c.bf16 %v721_v62, %v721_v62  ;;  %v928_v1 = vpop.f32.mrb[29].mxu0 }
 0x139   :  { %v724_v2 = vpop.f32.mrb[30].mxu0 }
 0x13a   :  { %v929_v3 = vpop.f32.mrb[31].mxu0  ;;  %933 = vmatmul.mubr.msk.bf16.vlgmr.msra.gmra.mrb[28].mxu1 %vm48_vm1, %v727_v63 }
 0x1d5   :  { %v136_v4 = vpop.f32.mrb[0].mxu1 }
 0x1d6   :  { %142 = vst [vmem:[#allocation7] sm:$0xff] %v136_v4  ;;  %v850_v5 = vpop.f32.mrb[1].mxu1 }
 0x1d7   :  { %v139_v6 = vpop.f32.mrb[2].mxu1 }
 0x1d8   :  { %v851_v7 = vpop.f32.mrb[3].mxu1 }
 0x1dd   :  { %v225_v8 = vpop.f32.mrb[4].mxu1 }
 0x1de   :  { %232 = vst [vmem:[#allocation7 + $0x8] sm:$0xff] %v225_v8  ;;  %v862_v9 = vpop.f32.mrb[5].mxu1 }
 0x1df   :  { %v228_v10 = vpop.f32.mrb[6].mxu1 }
 0x1e0   :  { %v863_v11 = vpop.f32.mrb[7].mxu1 }
 0x1e5   :  { %v315_v12 = vpop.f32.mrb[8].mxu1 }
 0x1e6   :  { %322 = vst [vmem:[#allocation7 + $0x10] sm:$0xff] %v315_v12  ;;  %v874_v0 = vpop.f32.mrb[9].mxu1 }
 0x1e7   :  { %v318_v13 = vpop.f32.mrb[10].mxu1 }
 0x1e8   :  { %v875_v14 = vpop.f32.mrb[11].mxu1 }
 0x1ed   :  { %v405_v15 = vpop.f32.mrb[12].mxu1 }
 0x1ee   :  { %412 = vst [vmem:[#allocation7 + $0x18] sm:$0xff] %v405_v15  ;;  %v886_v16 = vpop.f32.mrb[13].mxu1 }
 0x1ef   :  { %v408_v17 = vpop.f32.mrb[14].mxu1 }
 0x1f0   :  { %v887_v18 = vpop.f32.mrb[15].mxu1 }
 0x1f5   :  { %v495_v19 = vpop.f32.mrb[16].mxu1 }
 0x1f6   :  { %502 = vst [vmem:[#allocation7 + $0x20] sm:$0xff] %v495_v19  ;;  %v898_v20 = vpop.f32.mrb[17].mxu1 }
 0x1f7   :  { %v498_v21 = vpop.f32.mrb[18].mxu1 }
 0x1f8   :  { %v899_v22 = vpop.f32.mrb[19].mxu1 }
 0x1fd   :  { %v585_v23 = vpop.f32.mrb[20].mxu1 }
 0x1fe   :  { %592 = vst [vmem:[#allocation7 + $0x28] sm:$0xff] %v585_v23  ;;  %v910_v24 = vpop.f32.mrb[21].mxu1 }
 0x1ff   :  { %v588_v25 = vpop.f32.mrb[22].mxu1 }
 0x200   :  { %v911_v26 = vpop.f32.mrb[23].mxu1 }
 0x205   :  { %v675_v27 = vpop.f32.mrb[24].mxu1 }
 0x206   :  { %682 = vst [vmem:[#allocation7 + $0x30] sm:$0xff] %v675_v27  ;;  %v922_v28 = vpop.f32.mrb[25].mxu1 }
 0x207   :  { %v678_v29 = vpop.f32.mrb[26].mxu1 }
 0x208   :  { %v923_v30 = vpop.f32.mrb[27].mxu1 }
 0x20d   :  { %v765_v31 = vpop.f32.mrb[28].mxu1 }
 0x20e   :  { %772 = vst [vmem:[#allocation7 + $0x38] sm:$0xff] %v765_v31  ;;  %v934_v32 = vpop.f32.mrb[29].mxu1 }
 0x20f   :  { %v768_v33 = vpop.f32.mrb[30].mxu1 }
 0x210   :  { %999 = shalt.err (!%p996_p6)
}
 0x211   :  { %s1000_s15 = scalar_lea.hbm %s1172_s3, 1024 }
 0x212   :  { %p1001_p7 = scmp.ne.s32.totalorder %s1172_s3, %s1000_s15  ;;  %p1004_p8 = scmp.lt.u32.totalorder %s1000_s15, %s1172_s3 }
 0x214   :  { %p1006_p9 = pnand %p1004_p8, %p1001_p7 }
 0x216   :  { %1009 = shalt.err (!%p1006_p9)
}
 0x217   :  { %784 = dma.vmem_to_hbm [thread:$0]  %s779_s11, 1024, %s1172_s3, [#allocation4], %s1018_s0, %s1018_s0, %s1019_s7   ;;  %v935_v34 = vpop.f32.mrb[31].mxu1 }
 0x218   :  { %1014 = dma.done.wait [#allocation4], 1024  }
 0x219   :  { %1015 = vsyncadd [#allocation4], 4294966272 }
 0x21a   :  { %788 = vsyncpa [#allocation3], 1 }
 0x21b   :  { %789 = vsyncpa [#allocation6], 1 }
 0x21c   :  { %790 = vsyncpa [#allocation4], 1 }

</bundles_post_ra>
